<compile_context>
chip_gen: v7x
topology: tpu7x:2x2x1
jax: 0.10.0
libtpu: 0.0.40
codegen_flags: <defaults>
</compile_context>

<pallas_src>
import functools

import jax
import jax.numpy as jnp
from jax.experimental import pallas as pl
from jax.experimental.pallas import tpu as pltpu


def _round_up(x, m):
    return ((x + m - 1) // m) * m


def _patch_encoder_kernel(x_ref, o_ref, *, patch_len, stride, patch_num,
                          patches_per_store):
    # x_ref: (R, L_pad)                 -- slab of flattened (b, c) rows (pre-padded)
    # o_ref: (R, patch_num*patch_len)   -- lane-dense 2D slab, native unfold order:
    #                                      column n*patch_len + p == x[:, n*stride + p]
    x = x_ref[...]
    # Group ceil(128/patch_len) consecutive patches into one >=128-lane value and
    # issue a single wide store per group (instead of patch_num narrow masked
    # stores).  patch_num is static and small -> fully unrolled static slices.
    for n0 in range(0, patch_num, patches_per_store):
        g = min(patches_per_store, patch_num - n0)
        pieces = [x[:, (n0 + j) * stride:(n0 + j) * stride + patch_len]
                  for j in range(g)]
        val = pieces[0] if g == 1 else jnp.concatenate(pieces, axis=-1)
        o_ref[:, n0 * patch_len:(n0 + g) * patch_len] = val


def _pick_rows_per_block(rows, l_pad, out_cols, dtype):
    """Rows per grid step, budgeting the PADDED double-buffered VMEM footprint."""
    itemsize = jnp.dtype(dtype).itemsize
    sub = {4: 8, 2: 16, 1: 32}.get(itemsize, 8)     # sublane multiple per dtype
    # Per-row VMEM bytes: lane dims pad to 128; x2 for the pipeline's double
    # buffering of both the input block and the output block.
    per_row = 2 * (_round_up(l_pad, 128) + _round_up(out_cols, 128)) * itemsize
    budget = 12 * 1024 * 1024    # stays under v5e's 16 MiB default scoped VMEM
    r = max(sub, budget // per_row)
    # Guarantee >= 2 grid steps when the problem allows it so that
    # dimension_semantics=("parallel",) can shard work across both v7x TCs.
    if rows > sub:
        r = min(r, _round_up(pl.cdiv(rows, 2), sub))
    r = min(r, rows)
    if r >= rows:
        return rows                       # full-extent block is always legal
    return max(sub, (r // sub) * sub)     # keep the sublane multiple


def patch_encoder(x, *, patch_len, stride, padding_patch, transpose_out=True):
    """x: (B, C, L) -> (B, C, patch_len, patch_num). Matches PyTorch PatchEncoder."""
    B, C, L = x.shape
    if padding_patch == 'end':
        # ReplicationPad1d((0, stride)) hoisted out of the kernel (one fused XLA op).
        x = jnp.pad(x, ((0, 0), (0, 0), (0, stride)), mode='edge')
    L_pad = x.shape[-1]
    patch_num = (L_pad - patch_len) // stride + 1
    out_cols = patch_num * patch_len

    rows = B * C
    x_flat = x.reshape(rows, L_pad)

    R = _pick_rows_per_block(rows, L_pad, out_cols, x.dtype)
    grid = (pl.cdiv(rows, R),)
    patches_per_store = max(1, -(-128 // patch_len))   # ceil(128 / patch_len)

    kernel = functools.partial(
        _patch_encoder_kernel,
        patch_len=patch_len, stride=stride, patch_num=patch_num,
        patches_per_store=patches_per_store,
    )

    out_flat = pl.pallas_call(
        kernel,
        out_shape=jax.ShapeDtypeStruct((rows, out_cols), x.dtype),
        grid_spec=pltpu.PrefetchScalarGridSpec(
            num_scalar_prefetch=0,
            grid=grid,
            in_specs=[pl.BlockSpec((R, L_pad), lambda i: (i, 0))],
            out_specs=pl.BlockSpec((R, out_cols), lambda i: (i, 0)),
        ),
        compiler_params=pltpu.CompilerParams(
            dimension_semantics=("parallel",),
        ),
    )(x_flat)

    # Metadata-only reshape back to the unfold layout (no HBM pass).
    out = out_flat.reshape(B, C, patch_num, patch_len)
    if not transpose_out:
        # Native unfold order for consumers that can fold the permute
        # themselves (saves one full HBM pass over the output).
        return out
    # PyTorch layout (B, C, patch_len, patch_num).
    # TODO(synk): for patch_num >= 128 this permute could move in-kernel (XLU
    # vxpose) to save this HBM pass; for typical patch_num < 128 the lane-dense
    # native slab + this single transpose is the better trade.
    return jnp.transpose(out, (0, 1, 3, 2))


def _reference(x, *, patch_len, stride, padding_patch):
    # Pure-JAX reference of the PyTorch forward (for correctness check).
    if padding_patch == 'end':
        x = jnp.concatenate([x, jnp.repeat(x[..., -1:], stride, axis=-1)], axis=-1)
    L = x.shape[-1]
    patch_num = (L - patch_len) // stride + 1
    idx = (jnp.arange(patch_num)[:, None] * stride + jnp.arange(patch_len)[None, :])
    unf = x[..., idx]                        # (B, C, patch_num, patch_len)
    return jnp.transpose(unf, (0, 1, 3, 2))  # (B, C, patch_len, patch_num)


if __name__ == "__main__":
    # Small config consistent with the module: B=2, C=4, input_len=16,
    # patch_len=8, stride=4, padding_patch='end' -> patch_num=4.
    B, C, L = 2, 4, 16
    patch_len, stride, padding_patch = 8, 4, 'end'

    key = jax.random.PRNGKey(0)
    x = jax.random.normal(key, (B, C, L), dtype=jnp.float32)

    out = patch_encoder(x, patch_len=patch_len, stride=stride,
                        padding_patch=padding_patch)
    out = jax.block_until_ready(out)

    ref = _reference(x, patch_len=patch_len, stride=stride,
                     padding_patch=padding_patch)
    assert out.shape == ref.shape, (out.shape, ref.shape)
    assert jnp.allclose(out, ref), "mismatch vs reference"

    print("KERNEL_OK")
</pallas_src>

<mosaic_0001>
module attributes {stable_mosaic.version = 11 : i64} {
  func.func @_patch_encoder_kernel(%arg0: i32, %arg1: memref<8x20xf32, #tpu.memory_space<vmem>>, %arg2: memref<8x32xf32, #tpu.memory_space<vmem>>) attributes {dimension_semantics = [#tpu.dimension_semantics<parallel>], iteration_bounds = array<i64: 1>, scalar_prefetch = 0 : i64, scratch_operands = 0 : i64, tpu.core_type = #tpu.core_type<tc>, window_params = [{transform_indices = @transform_0, window_bounds = array<i64: 8, 20>}, {transform_indices = @transform_1, window_bounds = array<i64: 8, 32>}]} {
    %c0 = arith.constant 0 : index
    %c0_0 = arith.constant 0 : index
    %0 = vector.load %arg1[%c0, %c0_0] : memref<8x20xf32, #tpu.memory_space<vmem>>, vector<8x20xf32>
    %1 = vector.extract_strided_slice %0 {offsets = [0, 0], sizes = [8, 8], strides = [1, 1]} : vector<8x20xf32> to vector<8x8xf32>
    %2 = vector.extract_strided_slice %0 {offsets = [0, 4], sizes = [8, 8], strides = [1, 1]} : vector<8x20xf32> to vector<8x8xf32>
    %3 = vector.extract_strided_slice %0 {offsets = [0, 8], sizes = [8, 8], strides = [1, 1]} : vector<8x20xf32> to vector<8x8xf32>
    %4 = vector.extract_strided_slice %0 {offsets = [0, 12], sizes = [8, 8], strides = [1, 1]} : vector<8x20xf32> to vector<8x8xf32>
    %5 = tpu.concatenate %1, %2, %3, %4 in 1 : vector<8x8xf32>, vector<8x8xf32>, vector<8x8xf32>, vector<8x8xf32> -> vector<8x32xf32>
    %c0_1 = arith.constant 0 : index
    %c0_2 = arith.constant 0 : index
    %6 = vector.load %arg2[%c0_1, %c0_2] : memref<8x32xf32, #tpu.memory_space<vmem>>, vector<8x32xf32>
    tpu.vector_store %arg2[%c0_1, %c0_2], %5 {strides = array<i32>} : memref<8x32xf32, #tpu.memory_space<vmem>>, vector<8x32xf32>,
    return
  }
  func.func @transform_0(%arg0: i32) -> (i32, i32) {
    %c0_i32 = arith.constant 0 : i32
    %c0_i32_0 = arith.constant 0 : i32
    return %arg0, %c0_i32 : i32, i32
  }
  func.func @transform_1(%arg0: i32) -> (i32, i32) {
    %c0_i32 = arith.constant 0 : i32
    %c0_i32_0 = arith.constant 0 : i32
    return %arg0, %c0_i32 : i32, i32
  }
}

</mosaic_0001>

<bundles_post_ra>
// kernel: tpu_custom_call.1
= control target key start
LH: loop header
LB: loop body
LE: loop exit
PB: predicated region body
PF: predicated region fallthrough
CT: control target
= control target key end

     0   :  { %6 = vsyncpa [#allocation3], 0  ;;  %s147_s0 = inlined_call_operand.hbm [shape: f32[8,20], index: 0, kind: input, shape index: {}]   ;;  %s148_s1 = inlined_call_operand.hbm [shape: f32[8,32], index: 1, kind: output, shape index: {}]  }
   0x1   :  { %7 = vsyncpa [#allocation4], 0  ;;  %s108_s6 = smov [#allocation2]   ;;  %s60_s10 = scalar_lea.hbm %s147_s0, 128 }
   0x2   :  { %s14_s7 = sshll.u32 %s108_s6, 4  ;;  %p61_p0 = scmp.ne.s32.totalorder %s147_s0, %s60_s10  ;;  %s15_s7 = int_to_ptr.vmem [resolvable:$true] %s14_s7 }
   0x3   :  { %p64_p1 = scmp.lt.u32.totalorder %s60_s10, %s147_s0 }
   0x5   :  { %p66_p2 = pnand %p64_p1, %p61_p0 }
   0x7   :  { %69 = shalt.err (!%p66_p2)
}
   0x8   :  { %s70_s15 = scalar_lea.vmem %s15_s7, 128  ;;  %p75_p4 = scmp.lt.s32.totalorder %s15_s7, %s15_s7 }
   0x9   :  { %p71_p3 = scmp.ne.s32.totalorder %s15_s7, %s70_s15  ;;  %p76_p5 = scmp.lt.s32.totalorder %s70_s15, %s70_s15 }
   0xb   :  { %p77_p6 = por %p76_p5, %p75_p4 }
   0xd   :  { %p78_p7 = pnand %p77_p6, %p71_p3 }
   0xf   :  { %81 = shalt.err (!%p78_p7)
}
  0x10   :  { %17 = dma.hbm_to_vmem [thread:$0]  %s147_s0, 128, %s15_s7, [#allocation3]  }
  0x11   :  { %104 = dma.done.wait [#allocation3], 128  }
  0x12   :  { %105 = vsyncadd [#allocation3], 4294967168  ;;  %v21_v0 = vld [vmem:[#allocation2] sm:$0xff]  ;;  %s109_s18 = smov 4   ;;  %s110_s19 = smov 12   ;;  %vm32_vm0 = vcmask 64512  }
  0x13   :  { %23 = vrot.lane.b32.xlu0 %v21_v0, %s109_s18  ;;  %29 = vrot.lane.b32.xlu1 %v21_v0, %s110_s19  ;;  %s111_s20 = smov 8   ;;  %vm34_vm1 = vcmask 130048   ;;  %s112_s21 = smov [#allocation5]   ;;  %vm36_vm2 = vcmask 195584   ;;  %vm38_vm3 = vcmask 261120  }
  0x14   :  { %s46_s22 = sshll.u32 %s112_s21, 4  ;;  %s47_s22 = int_to_ptr.vmem [resolvable:$true] %s46_s22 }
  0x15   :  { %s82_s0 = scalar_lea.vmem %s47_s22, 128  ;;  %p87_p9 = scmp.lt.s32.totalorder %s47_s22, %s47_s22 }
  0x16   :  { %p83_p8 = scmp.ne.s32.totalorder %s47_s22, %s82_s0  ;;  %p88_p10 = scmp.lt.s32.totalorder %s82_s0, %s82_s0 }
  0x17   :  { %26 = vrot.lane.b32.xlu0 %v21_v0, %s111_s20 }
  0x18   :  { %p89_p11 = por %p88_p10, %p87_p9 }
  0x1a   :  { %p90_p12 = pnand %p89_p11, %p83_p8 }
  0x85   :  { %v24_v1 = vpop.permute.xlu0 %23  ;;  %v30_v2 = vpop.permute.xlu1 %29 }
  0x86   :  { %v33_v3 = vsel %vm32_vm0, %v21_v0, %v24_v1 }
  0x89   :  { %v27_v4 = vpop.permute.xlu0 %26 }
  0x8a   :  { %v35_v5 = vsel %vm34_vm1, %v33_v3, %v27_v4 }
  0x8b   :  { %v37_v6 = vsel %vm36_vm2, %v35_v5, %v30_v2 }
  0x8c   :  { %39 = vst.msk [vmem:[#allocation5] sm:$0xff] %vm38_vm3, %v37_v6 }
  0x8d   :  { %93 = shalt.err (!%p90_p12)
}
  0x8e   :  { %s94_s25 = scalar_lea.hbm %s148_s1, 128 }
  0x8f   :  { %p95_p13 = scmp.ne.s32.totalorder %s148_s1, %s94_s25  ;;  %p98_p0 = scmp.lt.u32.totalorder %s94_s25, %s148_s1 }
  0x91   :  { %p100_p1 = pnand %p98_p0, %p95_p13 }
  0x93   :  { %103 = shalt.err (!%p100_p1)
}
  0x94   :  { %49 = dma.vmem_to_hbm [thread:$0]  %s47_s22, 128, %s148_s1, [#allocation4]  }
  0x95   :  { %106 = dma.done.wait [#allocation4], 128  }
  0x96   :  { %107 = vsyncadd [#allocation4], 4294967168 }
  0x97   :  { %53 = vsyncpa [#allocation3], 1 }
  0x98   :  { %54 = vsyncpa [#allocation4], 1 }

</bundles_post_ra>
